<compile_context>
chip_gen: v7x
topology: tpu7x:2x2x1
jax: 0.10.0
libtpu: 0.0.40
codegen_flags: <defaults>
</compile_context>

<pallas_src>
import numpy as np
import jax
import jax.numpy as jnp
from jax.experimental import pallas as pl
from jax.experimental.pallas import tpu as pltpu

HIDDEN = 128
OUT = 32
OUT_PAD = 128        # lane-dense output width (sliced to OUT in the wrapper)


def _round_up(x, m):
    return ((x + m - 1) // m) * m


def _pick_tb(max_b):
    """Batch tile: fill sublanes for tiny per-node batches, fill the MXU
    M dimension (128 / 256) for genuinely large batches."""
    for tb in (16, 32, 64, 128):
        if max_b <= tb:
            return tb
    return 256


# ---------------------------------------------------------------------------
# Pallas kernel: 5-layer MLP (Linear+ReLU x4, Linear), one unit per grid tile.
# uid_ref is the scalar-prefetch unit-id vector (consumed by the index_maps).
# ---------------------------------------------------------------------------
def qpp_round_kernel(uid_ref, x_ref, w1_ref, wr_ref, b_ref, o_ref):
    del uid_ref
    bf16 = jnp.bfloat16
    f32max = jnp.finfo(jnp.float32).max
    f32min = jnp.finfo(jnp.float32).min

    # nan_to_num (nan->0, +inf->max, -inf->min) fused into the kernel.
    x = x_ref[...]
    x = jnp.where(jnp.isnan(x), 0.0, x)
    x = jnp.where(x == jnp.inf, f32max, x)
    x = jnp.where(x == -jnp.inf, f32min, x)
    x = x.astype(bf16)

    b = b_ref[...]                                   # (8, 128) f32

    h = jnp.dot(x, w1_ref[...], preferred_element_type=jnp.float32) + b[0:1, :]
    h = jnp.maximum(h, 0.0)
    for li in range(3):                              # hidden layers 2..4
        h = jnp.dot(h.astype(bf16), wr_ref[li],
                    preferred_element_type=jnp.float32) + b[li + 1:li + 2, :]
        h = jnp.maximum(h, 0.0)
    o = jnp.dot(h.astype(bf16), wr_ref[3],
                preferred_element_type=jnp.float32) + b[4:5, :]
    o_ref[...] = o.astype(o_ref.dtype)


# ---------------------------------------------------------------------------
# One-time parameter preparation: pad every unit to identical shapes and stack.
# ---------------------------------------------------------------------------
def stack_units(units_f32, dim_dict):
    ntypes = list(dim_dict.keys())
    U = len(ntypes)
    D_PAD = _round_up(max(dim_dict.values()), 128)

    W1 = np.zeros((U, D_PAD, HIDDEN), np.float32)
    WR = np.zeros((U, 4, HIDDEN, HIDDEN), np.float32)
    Bs = np.zeros((U, 8, OUT_PAD), np.float32)
    index = {}
    for u, nt in enumerate(ntypes):
        p = units_f32[nt]
        D = dim_dict[nt]
        index[nt] = u
        W1[u, :D, :] = np.asarray(p["w1"])
        for li in (2, 3, 4):
            WR[u, li - 2] = np.asarray(p[f"w{li}"])
        WR[u, 3, :, :OUT] = np.asarray(p["w5"])
        Bs[u, 0, :HIDDEN] = np.asarray(p["b1"]).reshape(-1)
        Bs[u, 1, :HIDDEN] = np.asarray(p["b2"]).reshape(-1)
        Bs[u, 2, :HIDDEN] = np.asarray(p["b3"]).reshape(-1)
        Bs[u, 3, :HIDDEN] = np.asarray(p["b4"]).reshape(-1)
        Bs[u, 4, :OUT] = np.asarray(p["b5"]).reshape(-1)

    return {
        "W1": jnp.asarray(W1, jnp.bfloat16),   # (U, D_PAD, 128)
        "WR": jnp.asarray(WR, jnp.bfloat16),   # (U, 4, 128, 128)
        "B": jnp.asarray(Bs, jnp.float32),     # (U, 8, 128)
        "index": index,
        "D_PAD": D_PAD,
    }


# ---------------------------------------------------------------------------
# One Pallas launch per tree round: all same-round segments (one per
# node-type group) stacked along the batch, per-tile unit-id via scalar
# prefetch.
# ---------------------------------------------------------------------------
def run_round(stacked, segments, *, tb=None):
    """segments: list of (unit_idx, x) with x (B_g, D_g) float32.
    Returns one (B_g, OUT) float32 array per segment."""
    D_PAD = stacked["D_PAD"]
    if tb is None:
        tb = _pick_tb(max(x.shape[0] for _, x in segments))

    xs, uids, metas = [], [], []
    for uidx, x in segments:
        B, D = x.shape
        Bp = _round_up(B, tb)
        xs.append(jnp.pad(x, ((0, Bp - B), (0, D_PAD - D))))
        uids.extend([uidx] * (Bp // tb))
        metas.append((B, Bp))
    x_all = jnp.concatenate(xs, axis=0) if len(xs) > 1 else xs[0]
    uid = jnp.asarray(uids, dtype=jnp.int32)

    N = x_all.shape[0]
    num_tiles = N // tb

    w_tile_bytes = (D_PAD * HIDDEN + 4 * HIDDEN * HIDDEN) * 2 + 8 * OUT_PAD * 4
    flops = 2 * N * (D_PAD * HIDDEN + 4 * HIDDEN * HIDDEN)
    bytes_accessed = (N * D_PAD * 4 + N * OUT_PAD * 4
                      + num_tiles * w_tile_bytes)

    out = pl.pallas_call(
        qpp_round_kernel,
        out_shape=jax.ShapeDtypeStruct((N, OUT_PAD), jnp.float32),
        grid_spec=pltpu.PrefetchScalarGridSpec(
            num_scalar_prefetch=1,
            grid=(num_tiles,),
            in_specs=[
                pl.BlockSpec((tb, D_PAD), lambda i, uid: (i, 0)),
                pl.BlockSpec((None, D_PAD, HIDDEN),
                             lambda i, uid: (uid[i], 0, 0)),
                pl.BlockSpec((None, 4, HIDDEN, HIDDEN),
                             lambda i, uid: (uid[i], 0, 0, 0)),
                pl.BlockSpec((None, 8, OUT_PAD),
                             lambda i, uid: (uid[i], 0, 0)),
            ],
            out_specs=pl.BlockSpec((tb, OUT_PAD), lambda i, uid: (i, 0)),
        ),
        compiler_params=pltpu.CompilerParams(
            dimension_semantics=("parallel",)),
        cost_estimate=pl.CostEstimate(
            flops=flops, transcendentals=0, bytes_accessed=bytes_accessed),
    )(uid, x_all, stacked["W1"], stacked["WR"], stacked["B"])

    outs, off = [], 0
    for B, Bp in metas:
        outs.append(out[off:off + B, :OUT])
        off += Bp
    return outs


# ---------------------------------------------------------------------------
# Pure-JAX references
# ---------------------------------------------------------------------------
def neural_unit_reference_f32(params, x):
    h = jnp.maximum(x @ params["w1"] + params["b1"], 0.0)
    h = jnp.maximum(h @ params["w2"] + params["b2"], 0.0)
    h = jnp.maximum(h @ params["w3"] + params["b3"], 0.0)
    h = jnp.maximum(h @ params["w4"] + params["b4"], 0.0)
    return h @ params["w5"] + params["b5"]


def neural_unit_reference_bf16(params, x):
    """Matches the kernel math: bf16 matmul operands, f32 accumulation."""
    bf16 = jnp.bfloat16

    def dot(a, w):
        return jnp.dot(a.astype(bf16), w.astype(bf16),
                       preferred_element_type=jnp.float32)

    h = jnp.maximum(dot(x, params["w1"]) + params["b1"], 0.0)
    h = jnp.maximum(dot(h, params["w2"]) + params["b2"], 0.0)
    h = jnp.maximum(dot(h, params["w3"]) + params["b3"], 0.0)
    h = jnp.maximum(dot(h, params["w4"]) + params["b4"], 0.0)
    return dot(h, params["w5"]) + params["b5"]


# ---------------------------------------------------------------------------
# QPPNet tree glue (same concat/pad/truncate/nan_to_num semantics as PyTorch)
# ---------------------------------------------------------------------------
def _flatten_tree(root):
    nodes = []

    def rec(n):
        child_ids = [rec(c) for c in n["children_plan"]]
        rnd = 0 if not child_ids else 1 + max(nodes[c]["round"] for c in child_ids)
        nodes.append({"node_type": n["node_type"], "feat_vec": n["feat_vec"],
                      "child_ids": child_ids, "round": rnd})
        return len(nodes) - 1

    root_id = rec(root)
    return nodes, root_id


def _node_input(node, outputs, dim_dict):
    x = node["feat_vec"]
    for cid in node["child_ids"]:
        x = jnp.concatenate([x, outputs[cid]], axis=1)
    expected = dim_dict[node["node_type"]]
    if expected > x.shape[1]:
        x = jnp.pad(x, ((0, 0), (0, expected - x.shape[1])))
    elif expected < x.shape[1]:
        x = x[:, :expected]
    return x   # nan_to_num happens inside the Pallas kernel


def construct_tree_net_batched(stacked, dim_dict, root, *, tb=None):
    """QPPNet.construct_tree_net with every node that becomes ready in the
    same round evaluated in a single Pallas launch (same-type nodes batched,
    different types handled via per-tile unit ids)."""
    nodes, root_id = _flatten_tree(root)
    outputs = [None] * len(nodes)
    for rnd in range(max(n["round"] for n in nodes) + 1):
        groups = {}
        for nid, n in enumerate(nodes):
            if n["round"] != rnd:
                continue
            groups.setdefault(n["node_type"], []).append(
                (nid, _node_input(n, outputs, dim_dict)))
        segments, seg_items = [], []
        for ntype, items in groups.items():
            xs = (jnp.concatenate([x for _, x in items], axis=0)
                  if len(items) > 1 else items[0][1])
            segments.append((stacked["index"][ntype], xs))
            seg_items.append(items)
        outs = run_round(stacked, segments, tb=tb)
        for y, items in zip(outs, seg_items):
            off = 0
            for nid, x in items:
                outputs[nid] = y[off:off + x.shape[0]]
                off += x.shape[0]
    return outputs[root_id]


def construct_tree_net_reference(units, dim_dict, samp, forward_fn):
    x = samp["feat_vec"]
    for child in samp["children_plan"]:
        child_out = construct_tree_net_reference(units, dim_dict, child, forward_fn)
        x = jnp.concatenate([x, child_out], axis=1)
    expected = dim_dict[samp["node_type"]]
    if expected > x.shape[1]:
        x = jnp.pad(x, ((0, 0), (0, expected - x.shape[1])))
    elif expected < x.shape[1]:
        x = x[:, :expected]
    x = jnp.nan_to_num(x, nan=0.0)
    return forward_fn(units[samp["node_type"]], x)


# ---------------------------------------------------------------------------
# Deterministic synthetic setup (no featurizer / file IO)
# ---------------------------------------------------------------------------
def build_dim_dict(num_rel, max_num_attr, num_index):
    return {
        "Seq Scan": num_rel + max_num_attr * 2 + 3,
        "Index Scan": num_index + num_rel + max_num_attr * 2 + 3 + 1,
        "Index Only Scan": num_index + num_rel + max_num_attr * 2 + 3 + 1,
        "Bitmap Heap Scan": num_rel + max_num_attr * 2 + 3,
        "Bitmap Index Scan": num_rel + max_num_attr * 2 + 3,
        "Sort": 3 + 2 + num_rel * max_num_attr + 32,
        "Hash": 4 + 32,
        "Hash Join": 10 + 3 + 32 * 2,
        "Merge Join": 10 + 3 + 32 * 2,
        "Aggregate": 3 + 4 + 1 + 32,
        "Nested Loop": 32 * 2 + 3,
        "Limit": 32 + 3,
        "Materialize": 32 + 3,
    }


def init_linear(key, fan_in, fan_out):
    kw, kb = jax.random.split(key)
    bound = 1.0 / np.sqrt(fan_in)
    w = jax.random.uniform(kw, (fan_in, fan_out), jnp.float32, -bound, bound)
    b = jax.random.uniform(kb, (1, fan_out), jnp.float32, -bound, bound)
    return w, b


def init_neural_unit(key, input_dim):
    keys = jax.random.split(key, 5)
    sizes = [(input_dim, HIDDEN), (HIDDEN, HIDDEN), (HIDDEN, HIDDEN),
             (HIDDEN, HIDDEN), (HIDDEN, OUT)]
    params = {}
    for li, (k, (fi, fo)) in enumerate(zip(keys, sizes), start=1):
        w, b = init_linear(k, fi, fo)
        params[f"w{li}"] = w
        params[f"b{li}"] = b
    return params


# TODO(synk): featurize.featurizer (DB-schema-driven vectorization) has no
# Pallas equivalent; synthetic feat_vecs stand in for get_input() output.
if __name__ == "__main__":
    key = jax.random.PRNGKey(0)

    # synthetic schema: 3 relations, max 4 attrs, 2 indexes
    num_rel, max_num_attr, num_index = 3, 4, 2
    dim_dict = build_dim_dict(num_rel, max_num_attr, num_index)

    # one NeuralUnit per operator (deterministic init) + one-time stacking
    units_f32 = {}
    k_units = jax.random.split(key, len(dim_dict) + 1)
    for (op, d), k in zip(dim_dict.items(), k_units[:-1]):
        units_f32[op] = init_neural_unit(k, d)
    stacked = stack_units(units_f32, dim_dict)

    # synthetic vectorized plan tree (what get_input would produce):
    #   Hash Join
    #     |-- Seq Scan
    #     `-- Hash -- Index Scan
    batch = 6  # subbatch_size
    kf = jax.random.split(k_units[-1], 6)
    raw_dims = {"Hash Join": 13, "Seq Scan": dim_dict["Seq Scan"],
                "Hash": 4, "Index Scan": dim_dict["Index Scan"]}

    def feat(k, op):
        return jax.random.normal(k, (batch, raw_dims[op]), jnp.float32)

    samp_batch = {
        "node_type": "Hash Join",
        "subbatch_size": batch,
        "feat_vec": feat(kf[0], "Hash Join"),
        "total_time": jnp.ones((batch,), jnp.float32),
        "is_subplan": False,
        "children_plan": [
            {"node_type": "Seq Scan", "subbatch_size": batch,
             "feat_vec": feat(kf[1], "Seq Scan"), "children_plan": []},
            {"node_type": "Hash", "subbatch_size": batch,
             "feat_vec": feat(kf[2], "Hash"),
             "children_plan": [
                 {"node_type": "Index Scan", "subbatch_size": batch,
                  "feat_vec": feat(kf[3], "Index Scan"), "children_plan": []},
             ]},
        ],
    }

    # QPPNet.forward == construct_tree_net(get_input(X)), one launch per round
    out = construct_tree_net_batched(stacked, dim_dict, samp_batch)
    out = jax.block_until_ready(out)
    assert out.shape == (batch, OUT)

    # tight check: kernel vs pure-JAX reference of the identical bf16/f32 math
    ref_bf16 = construct_tree_net_reference(units_f32, dim_dict, samp_batch,
                                            neural_unit_reference_bf16)
    ref_bf16 = jax.block_until_ready(ref_bf16)
    np.testing.assert_allclose(np.asarray(out), np.asarray(ref_bf16),
                               rtol=2e-3, atol=2e-3)

    # loose check: kernel vs full-f32 reference (bf16 operand rounding)
    ref_f32 = construct_tree_net_reference(units_f32, dim_dict, samp_batch,
                                           neural_unit_reference_f32)
    ref_f32 = jax.block_until_ready(ref_f32)
    np.testing.assert_allclose(np.asarray(out), np.asarray(ref_f32),
                               rtol=1e-1, atol=5e-2)

    # extra check: multi-tile / multi-unit single launch (per-tile unit ids)
    xa = jax.random.normal(kf[4], (20, dim_dict["Seq Scan"]), jnp.float32)
    xb = jax.random.normal(kf[5], (40, dim_dict["Hash"]), jnp.float32)
    ya, yb = run_round(stacked,
                       [(stacked["index"]["Seq Scan"], xa),
                        (stacked["index"]["Hash"], xb)], tb=16)
    ya, yb = jax.block_until_ready((ya, yb))
    np.testing.assert_allclose(
        np.asarray(ya),
        np.asarray(neural_unit_reference_bf16(units_f32["Seq Scan"], xa)),
        rtol=2e-3, atol=2e-3)
    np.testing.assert_allclose(
        np.asarray(yb),
        np.asarray(neural_unit_reference_bf16(units_f32["Hash"], xb)),
        rtol=2e-3, atol=2e-3)

    print("KERNEL_OK")
</pallas_src>

<mosaic_0001>
module attributes {stable_mosaic.version = 11 : i64} {
  func.func @qpp_round_kernel(%arg0: i32, %arg1: memref<2xi32, #tpu.memory_space<smem>>, %arg2: memref<16x128xf32, #tpu.memory_space<vmem>>, %arg3: memref<1x128x128xbf16, #tpu.memory_space<vmem>>, %arg4: memref<1x4x128x128xbf16, #tpu.memory_space<vmem>>, %arg5: memref<1x8x128xf32, #tpu.memory_space<vmem>>, %arg6: memref<16x128xf32, #tpu.memory_space<vmem>>) attributes {dimension_semantics = [#tpu.dimension_semantics<parallel>], iteration_bounds = array<i64: 2>, scalar_prefetch = 1 : i64, scratch_operands = 0 : i64, tpu.core_type = #tpu.core_type<tc>, window_params = [{transform_indices = @transform_0, window_bounds = array<i64: 16, 128>}, {transform_indices = @transform_1, window_bounds = array<i64: 1, 128, 128>}, {transform_indices = @transform_2, window_bounds = array<i64: 1, 4, 128, 128>}, {transform_indices = @transform_3, window_bounds = array<i64: 1, 8, 128>}, {transform_indices = @transform_4, window_bounds = array<i64: 16, 128>}]} {
    %c0 = arith.constant 0 : index
    %c0_0 = arith.constant 0 : index
    %0 = vector.load %arg2[%c0, %c0_0] : memref<16x128xf32, #tpu.memory_space<vmem>>, vector<16x128xf32>
    %1 = arith.cmpf one, %0, %0 : vector<16x128xf32>
    %cst = arith.constant 0.000000e+00 : f32
    %2 = vector.broadcast %cst : f32 to vector<16x128xf32>
    %3 = arith.select %1, %2, %0 : vector<16x128xi1>, vector<16x128xf32>
    %cst_1 = arith.constant 0x7F800000 : f32
    %4 = vector.broadcast %cst_1 : f32 to vector<16x128xf32>
    %5 = arith.cmpf oeq, %3, %4 : vector<16x128xf32>
    %cst_2 = arith.constant 3.40282347E+38 : f32
    %6 = vector.broadcast %cst_2 : f32 to vector<16x128xf32>
    %7 = arith.select %5, %6, %3 : vector<16x128xi1>, vector<16x128xf32>
    %cst_3 = arith.constant 0xFF800000 : f32
    %8 = vector.broadcast %cst_3 : f32 to vector<16x128xf32>
    %9 = arith.cmpf oeq, %7, %8 : vector<16x128xf32>
    %cst_4 = arith.constant -3.40282347E+38 : f32
    %10 = vector.broadcast %cst_4 : f32 to vector<16x128xf32>
    %11 = arith.select %9, %10, %7 : vector<16x128xi1>, vector<16x128xf32>
    %12 = arith.truncf %11 : vector<16x128xf32> to vector<16x128xbf16>
    %c0_5 = arith.constant 0 : index
    %c0_6 = arith.constant 0 : index
    %c0_7 = arith.constant 0 : index
    %13 = vector.load %arg5[%c0_5, %c0_6, %c0_7] : memref<1x8x128xf32, #tpu.memory_space<vmem>>, vector<1x8x128xf32>
    %14 = vector.shape_cast %13 : vector<1x8x128xf32> to vector<8x128xf32>
    %c0_8 = arith.constant 0 : index
    %c0_9 = arith.constant 0 : index
    %c0_10 = arith.constant 0 : index
    %15 = vector.load %arg3[%c0_8, %c0_9, %c0_10] : memref<1x128x128xbf16, #tpu.memory_space<vmem>>, vector<1x128x128xbf16>
    %16 = vector.shape_cast %15 : vector<1x128x128xbf16> to vector<128x128xbf16>
    %cst_11 = arith.constant dense<0.000000e+00> : vector<16x128xf32>
    %17 = tpu.matmul %12, %16, %cst_11 {dimension_numbers = #tpu.dot_dimension_numbers<[1], [0], [0], [1], [0, 0, 1, 1], [], []>} : vector<16x128xbf16>, vector<128x128xbf16>, vector<16x128xf32> -> vector<16x128xf32>
    %18 = vector.extract_strided_slice %14 {offsets = [0, 0], sizes = [1, 128], strides = [1, 1]} : vector<8x128xf32> to vector<1x128xf32>
    %19 = vector.broadcast %18 : vector<1x128xf32> to vector<16x128xf32>
    %20 = arith.addf %17, %19 : vector<16x128xf32>
    %cst_12 = arith.constant 0.000000e+00 : f32
    %21 = vector.broadcast %cst_12 : f32 to vector<16x128xf32>
    %22 = arith.maximumf %20, %21 : vector<16x128xf32>
    %23 = arith.truncf %22 : vector<16x128xf32> to vector<16x128xbf16>
    %c0_13 = arith.constant 0 : index
    %c0_14 = arith.constant 0 : index
    %c0_15 = arith.constant 0 : index
    %c0_16 = arith.constant 0 : index
    %24 = vector.load %arg4[%c0_13, %c0_14, %c0_15, %c0_16] : memref<1x4x128x128xbf16, #tpu.memory_space<vmem>>, vector<1x1x128x128xbf16>
    %25 = vector.shape_cast %24 : vector<1x1x128x128xbf16> to vector<128x128xbf16>
    %cst_17 = arith.constant dense<0.000000e+00> : vector<16x128xf32>
    %26 = tpu.matmul %23, %25, %cst_17 {dimension_numbers = #tpu.dot_dimension_numbers<[1], [0], [0], [1], [0, 0, 1, 1], [], []>} : vector<16x128xbf16>, vector<128x128xbf16>, vector<16x128xf32> -> vector<16x128xf32>
    %27 = vector.extract_strided_slice %14 {offsets = [1, 0], sizes = [1, 128], strides = [1, 1]} : vector<8x128xf32> to vector<1x128xf32>
    %28 = vector.broadcast %27 : vector<1x128xf32> to vector<16x128xf32>
    %29 = arith.addf %26, %28 : vector<16x128xf32>
    %cst_18 = arith.constant 0.000000e+00 : f32
    %30 = vector.broadcast %cst_18 : f32 to vector<16x128xf32>
    %31 = arith.maximumf %29, %30 : vector<16x128xf32>
    %32 = arith.truncf %31 : vector<16x128xf32> to vector<16x128xbf16>
    %c0_19 = arith.constant 0 : index
    %c1 = arith.constant 1 : index
    %c0_20 = arith.constant 0 : index
    %c0_21 = arith.constant 0 : index
    %33 = vector.load %arg4[%c0_19, %c1, %c0_20, %c0_21] : memref<1x4x128x128xbf16, #tpu.memory_space<vmem>>, vector<1x1x128x128xbf16>
    %34 = vector.shape_cast %33 : vector<1x1x128x128xbf16> to vector<128x128xbf16>
    %cst_22 = arith.constant dense<0.000000e+00> : vector<16x128xf32>
    %35 = tpu.matmul %32, %34, %cst_22 {dimension_numbers = #tpu.dot_dimension_numbers<[1], [0], [0], [1], [0, 0, 1, 1], [], []>} : vector<16x128xbf16>, vector<128x128xbf16>, vector<16x128xf32> -> vector<16x128xf32>
    %36 = vector.extract_strided_slice %14 {offsets = [2, 0], sizes = [1, 128], strides = [1, 1]} : vector<8x128xf32> to vector<1x128xf32>
    %37 = vector.broadcast %36 : vector<1x128xf32> to vector<16x128xf32>
    %38 = arith.addf %35, %37 : vector<16x128xf32>
    %cst_23 = arith.constant 0.000000e+00 : f32
    %39 = vector.broadcast %cst_23 : f32 to vector<16x128xf32>
    %40 = arith.maximumf %38, %39 : vector<16x128xf32>
    %41 = arith.truncf %40 : vector<16x128xf32> to vector<16x128xbf16>
    %c0_24 = arith.constant 0 : index
    %c2 = arith.constant 2 : index
    %c0_25 = arith.constant 0 : index
    %c0_26 = arith.constant 0 : index
    %42 = vector.load %arg4[%c0_24, %c2, %c0_25, %c0_26] : memref<1x4x128x128xbf16, #tpu.memory_space<vmem>>, vector<1x1x128x128xbf16>
    %43 = vector.shape_cast %42 : vector<1x1x128x128xbf16> to vector<128x128xbf16>
    %cst_27 = arith.constant dense<0.000000e+00> : vector<16x128xf32>
    %44 = tpu.matmul %41, %43, %cst_27 {dimension_numbers = #tpu.dot_dimension_numbers<[1], [0], [0], [1], [0, 0, 1, 1], [], []>} : vector<16x128xbf16>, vector<128x128xbf16>, vector<16x128xf32> -> vector<16x128xf32>
    %45 = vector.extract_strided_slice %14 {offsets = [3, 0], sizes = [1, 128], strides = [1, 1]} : vector<8x128xf32> to vector<1x128xf32>
    %46 = vector.broadcast %45 : vector<1x128xf32> to vector<16x128xf32>
    %47 = arith.addf %44, %46 : vector<16x128xf32>
    %cst_28 = arith.constant 0.000000e+00 : f32
    %48 = vector.broadcast %cst_28 : f32 to vector<16x128xf32>
    %49 = arith.maximumf %47, %48 : vector<16x128xf32>
    %50 = arith.truncf %49 : vector<16x128xf32> to vector<16x128xbf16>
    %c0_29 = arith.constant 0 : index
    %c3 = arith.constant 3 : index
    %c0_30 = arith.constant 0 : index
    %c0_31 = arith.constant 0 : index
    %51 = vector.load %arg4[%c0_29, %c3, %c0_30, %c0_31] : memref<1x4x128x128xbf16, #tpu.memory_space<vmem>>, vector<1x1x128x128xbf16>
    %52 = vector.shape_cast %51 : vector<1x1x128x128xbf16> to vector<128x128xbf16>
    %cst_32 = arith.constant dense<0.000000e+00> : vector<16x128xf32>
    %53 = tpu.matmul %50, %52, %cst_32 {dimension_numbers = #tpu.dot_dimension_numbers<[1], [0], [0], [1], [0, 0, 1, 1], [], []>} : vector<16x128xbf16>, vector<128x128xbf16>, vector<16x128xf32> -> vector<16x128xf32>
    %54 = vector.extract_strided_slice %14 {offsets = [4, 0], sizes = [1, 128], strides = [1, 1]} : vector<8x128xf32> to vector<1x128xf32>
    %55 = vector.broadcast %54 : vector<1x128xf32> to vector<16x128xf32>
    %56 = arith.addf %53, %55 : vector<16x128xf32>
    %c0_33 = arith.constant 0 : index
    %c0_34 = arith.constant 0 : index
    %57 = vector.load %arg6[%c0_33, %c0_34] : memref<16x128xf32, #tpu.memory_space<vmem>>, vector<16x128xf32>
    tpu.vector_store %arg6[%c0_33, %c0_34], %56 {strides = array<i32>} : memref<16x128xf32, #tpu.memory_space<vmem>>, vector<16x128xf32>,
    return
  }
  func.func @transform_0(%arg0: i32, %arg1: memref<2xi32, #tpu.memory_space<smem>>) -> (i32, i32) {
    %c0_i32 = arith.constant 0 : i32
    %c0_i32_0 = arith.constant 0 : i32
    return %arg0, %c0_i32 : i32, i32
  }
  func.func @transform_1(%arg0: i32, %arg1: memref<2xi32, #tpu.memory_space<smem>>) -> (i32, i32, i32) {
    %0 = arith.index_cast %arg0 : i32 to index
    %1 = memref.load %arg1[%0] : memref<2xi32, #tpu.memory_space<smem>>
    %c0_i32 = arith.constant 0 : i32
    %c0_i32_0 = arith.constant 0 : i32
    %c0_i32_1 = arith.constant 0 : i32
    return %1, %c0_i32, %c0_i32_0 : i32, i32, i32
  }
  func.func @transform_2(%arg0: i32, %arg1: memref<2xi32, #tpu.memory_space<smem>>) -> (i32, i32, i32, i32) {
    %0 = arith.index_cast %arg0 : i32 to index
    %1 = memref.load %arg1[%0] : memref<2xi32, #tpu.memory_space<smem>>
    %c0_i32 = arith.constant 0 : i32
    %c0_i32_0 = arith.constant 0 : i32
    %c0_i32_1 = arith.constant 0 : i32
    %c0_i32_2 = arith.constant 0 : i32
    return %1, %c0_i32, %c0_i32_0, %c0_i32_1 : i32, i32, i32, i32
  }
  func.func @transform_3(%arg0: i32, %arg1: memref<2xi32, #tpu.memory_space<smem>>) -> (i32, i32, i32) {
    %0 = arith.index_cast %arg0 : i32 to index
    %1 = memref.load %arg1[%0] : memref<2xi32, #tpu.memory_space<smem>>
    %c0_i32 = arith.constant 0 : i32
    %c0_i32_0 = arith.constant 0 : i32
    %c0_i32_1 = arith.constant 0 : i32
    return %1, %c0_i32, %c0_i32_0 : i32, i32, i32
  }
  func.func @transform_4(%arg0: i32, %arg1: memref<2xi32, #tpu.memory_space<smem>>) -> (i32, i32) {
    %c0_i32 = arith.constant 0 : i32
    %c0_i32_0 = arith.constant 0 : i32
    return %arg0, %c0_i32 : i32, i32
  }
}

</mosaic_0001>

<bundles_post_ra>
// kernel: tpu_custom_call.1
= control target key start
LH: loop header
LB: loop body
LE: loop exit
PB: predicated region body
PF: predicated region fallthrough
CT: control target
= control target key end

     0   :  { %s2493_s0 = inlined_call_operand.hbm [shape: s32[2], index: 0, kind: input, shape index: {}]   ;;  %s2494_s1 = inlined_call_operand.hbm [shape: f32[32,128], index: 1, kind: input, shape index: {}]   ;;  %s2495_s2 = inlined_call_operand.hbm [shape: bf16[13,128,128], index: 2, kind: input, shape index: {}]   ;;  %s2496_s3 = inlined_call_operand.hbm [shape: bf16[13,4,128,128], index: 3, kind: input, shape index: {}]   ;;  %s2497_s4 = inlined_call_operand.hbm [shape: f32[13,8,128], index: 4, kind: input, shape index: {}]   ;;  %s2498_s5 = inlined_call_operand.hbm [shape: f32[32,128], index: 5, kind: output, shape index: {}]  }
   0x1   :  { %2515 = sst [smem:[#allocation33_spill]] %s2494_s1  ;;  %s1537_s20 = scalar_lea.hbm %s2493_s0, 16 }
   0x2   :  { %2516 = sst [smem:[#allocation34_spill]] %s2495_s2  ;;  %p1538_p0 = scmp.ne.s32.totalorder %s2493_s0, %s1537_s20 }
   0x3   :  { %2517 = sst [smem:[#allocation35_spill]] %s2496_s3  ;;  %p1541_p1 = scmp.lt.u32.totalorder %s1537_s20, %s2493_s0 }
   0x4   :  { %2518 = sst [smem:[#allocation36_spill]] %s2498_s5 }
   0x5   :  { %p1543_p2 = pnand %p1541_p1, %p1538_p0 }
   0x7   :  { %1546 = shalt.err (!%p1543_p2)  }
   0x8   :  { %s1821_s25 = smov [#allocation3]  }
   0x9   :  { %11 = dma.hbm_to_smem %s2493_s0, 16, %s1821_s25, [#allocation2] }
   0xa   :  { %1747 = dma.done.wait [#allocation2], 16 }
   0xb   :  { %1748 = vsyncadd [#allocation2], 4294967280 }
   0xc   :  { %13 = sfence }
   0xd   :  { %14 = vsyncpa [#allocation5], 0 }
   0xe   :  { %16 = vsyncpa [#allocation5 + $0x1], 0 }
   0xf   :  { %17 = vsyncpa [#allocation8], 0 }
  0x10   :  { %19 = vsyncpa [#allocation8 + $0x1], 0 }
  0x11   :  { %20 = vsyncpa [#allocation11], 0 }
  0x12   :  { %22 = vsyncpa [#allocation11 + $0x1], 0 }
  0x13   :  { %23 = vsyncpa [#allocation6], 0 }
  0x14   :  { %25 = vsyncpa [#allocation6 + $0x1], 0  ;;  %s1877_s28 = smov 0   ;;  %s1879_s29 = smov 0  }
  0x15   :  { %s1881_s30 = smov 0   ;;  %s1883_s6 = smov 0  }
  0x16   :  { %s1885_s0 = smov 0   ;;  %s1887_s7 = smov 0  }
  0x17   :  { %s1889_s8 = smov 0   ;;  %s1891_s9 = smov 0  }
  0x18   :  { %s1893_s10 = smov 0   ;;  %s1895_s11 = smov 0  }
  0x19   :  { %s1897_s12 = smov 0   ;;  %s1899_s13 = smov 0  }
  0x1a   :  { %s1901_s14 = smov 0  }
  0x1b LB: > { %2519 = sst [smem:[#allocation25_spill]] %s1791_s7  ;;  %s1941_s15 = sadd.s32 4294967295, %s1819_s14   ;;  %s1819_s14 = sphi %s1901_s14, %s2586_s14   ;;  %s1815_s13 = sphi %s1899_s13, %s2578_s13   ;;  %s1811_s12 = sphi %s1897_s12, %s2585_s12   ;;  %s1807_s11 = sphi %s1895_s11, %s2584_s11   ;;  %s1803_s10 = sphi %s1893_s10, %s2576_s10   ;;  %s1799_s9 = sphi %s1891_s9, %s2575_s9   ;;  %s1795_s8 = sphi %s1889_s8, %s2574_s8   ;;  %s1791_s7 = sphi %s1887_s7, %s2573_s7   ;;  %s1787_s0 = sphi %s1885_s0, %s2583_s0   ;;  %s1783_s6 = sphi %s1883_s6, %s2582_s6   ;;  %s1779_s30 = sphi %s1881_s30, %s2581_s30   ;;  %s1775_s29 = sphi %s1879_s29, %s2580_s29   ;;  %s1771_s28 = sphi %s1877_s28, %s2579_s28  }
  0x1c   : > { %2520 = sst [smem:[#allocation26_spill]] %s1799_s9  ;;  %s1944_s16 = sadd.s32 1, %s1819_s14  }
  0x1d   : > { %2521 = sst [smem:[#allocation27_spill]] %s1803_s10  ;;  %p2505_p3 = scmp.eq.s32.totalorder %s1819_s14, 0 }
  0x1e   : > { %2522 = sst [smem:[#allocation28_spill]] %s1815_s13  ;;  %p2504_p4 = scmp.eq.s32.totalorder %s1941_s15, 0 }
  0x1f   : > { %s61_s17 = sld [smem:[#allocation3 + %s1819_s14]]  ;;  %s66_s19 = sadd.s32 1, %s1803_s10 }
  0x20   : > { %s62_s18 = sld [smem:[#allocation3 + %s1944_s16]]  ;;  %p73_p5 = scmp.ne.s32.totalorder %s1803_s10, %s1799_s9 }
  0x21   : > { %p79_p6 = scmp.ne.s32.totalorder %s1799_s9, %s1795_s8  ;;  %p2503_p9 = scmp.lt.s32.totalorder %s1819_s14, 2 }
  0x22   : > { %p1957_p8 = por %p73_p5, %p2505_p3  ;;  %s206_s22 = sand.u32 1, %s1819_s14  }
  0x23   : > { %p1964_p10 = por %p79_p6, %p2504_p4  ;;  %s208_s23 = sand.u32 1, %s1803_s10  }
  0x24   : > { %s1087_s25 = sshll.u32 %s208_s23, 6  ;;  %p1986_p12 = pnand %p2503_p9, %p1957_p8 }
  0x25   : > { %s2524_s21 = scalar_select %p1964_p10, 1, 0 }
  0x26   : > { %s63_s24 = ssub.s32 %s61_s17, %s62_s18  ;;  %s210_s5 = scalar_lea.vmem [#allocation7], %s1087_s25 }
  0x27   : > { %2525 = sst [smem:[#allocation29_spill]] %s2524_s21  ;;  %p64_p11 = scmp.eq.s32.totalorder %s63_s24, 0 }
  0x28   : > { %s1344_s26 = scalar_select %p1957_p8, [#allocation3], [#allocation13] }
  0x29   : > { %s1973_s27 = scalar_select %p64_p11, %s1803_s10, %s66_s19  }
  0x2a   : > { %s1345_s8 = scalar_select %p1957_p8, %s1819_s14, 0 }
  0x2b   : > { %2526 = sst [smem:[#allocation30_spill]] %s1973_s27  ;;  %s2588_s26 = smov (!%p2503_p9, %s1344_s26), [#allocation16] }
  0x2c   : > { %s2590_s8 = smov (!%p2503_p9, %s1345_s8), 0  ;;  %s218_s9 = sshll.u32 %s210_s5, 4  ;;  %s1990_s9 = int_to_ptr.vmem [resolvable:$true] %s218_s9 }
  0x2d   : > { %s211_s17 = sld [smem:[%s2588_s26 + %s2590_s8]]  ;;  %p1095_p13 = scmp.ge.s32.totalorder %s1819_s14, 1 }
  0x2e   : > { %p267_p0 = scmp.lt.s32.totalorder %s1819_s14, 3  ;;  %s2529_s2 = sld [smem:[#allocation34_spill]] }
  0x2f   : > { %s2003_s24 = scalar_lea.sflag [#allocation8], %s206_s22  ;;  %p1549_p5 = pneg %p1986_p12 }
  0x30   : > { %p1994_p1 = pnand %p1095_p13, %p267_p0 }
  0x32   : > { %s2528_s18 = scalar_select %p1994_p1, 1, 0 }
  0x33   : > { %s1195_s19 = sshll.u32 %s211_s17, 10 }
  0x34   : > { %s2001_s20 = scalar_lea.hbm %s2529_s2, %s1195_s19  ;;  %s1552_s17 = scalar_lea.hbm %s2529_s2, 13312 }
  0x35   : > { %s1547_s25 = scalar_lea.hbm %s2001_s20, 1024  ;;  %p1553_p11 = scmp.lt.u32.totalorder %s2001_s20, %s2529_s2 }
  0x36   : > { %p1548_p2 = scmp.ne.s32.totalorder %s2001_s20, %s1547_s25  ;;  %p1554_p13 = scmp.lt.u32.totalorder %s1552_s17, %s1547_s25 }
  0x37   : > { %p1556_p7 = scmp.lt.u32.totalorder %s1547_s25, %s2001_s20 }
  0x38   : > { %p1550_p6 = pnand %p1549_p5, %p1548_p2  ;;  %p1555_p0 = por %p1554_p13, %p1553_p11 }
  0x3a   : > { %p1551_p8 = pneg %p1550_p6  ;;  %p1557_p9 = por %p1556_p7, %p1555_p0 }
  0x3c   : > { %p1558_p4 = pnand %p1557_p9, %p1551_p8 }
  0x3e   : > { %1561 = shalt.err (!%p1558_p4)
}
  0x3f   : > { %s1562_s22 = scalar_lea.vmem %s1990_s9, 1024  ;;  %s1822_s5 = smov [#allocation7]  }
  0x40   : > { %p1563_p2 = scmp.ne.s32.totalorder %s1990_s9, %s1562_s22  ;;  %s1567_s26 = sshll.u32 %s1822_s5, 4  ;;  %s1568_s26 = int_to_ptr.vmem [resolvable:$false] %s1567_s26 }
  0x41   : > { %s1569_s8 = scalar_lea.vmem %s1568_s26, 2048  ;;  %p1570_p10 = scmp.lt.s32.totalorder %s1990_s9, %s1568_s26 }
  0x42   : > { %p1565_p6 = pnand %p1563_p2, %p1549_p5  ;;  %p1571_p11 = scmp.lt.s32.totalorder %s1569_s8, %s1562_s22 }
  0x44   : > { %p1566_p3 = pneg %p1565_p6  ;;  %p1572_p13 = por %p1571_p11, %p1570_p10 }
  0x46   : > { %p1573_p7 = pnand %p1572_p13, %p1566_p3 }
  0x48   : > { %1576 = shalt.err (!%p1573_p7)
}
  0x49   : > { %s2507_s25 = smov 64   ;;  %s2508_s17 = smov 4  }
  0x4a   : > { %1367 = dma.hbm_to_vmem [thread:$0]  (!%p1986_p12), %s2001_s20, 1024, %s1990_s9, %s2003_s24, %s2507_s25, %s2507_s25, %s2508_s17  }
  0x4b   : > { %s1081_s19 = sadd.s32 4294967294, %s1819_s14   ;;  %s35_s23 = ssub.s32 %s1819_s14, %s1944_s16 }
  0x4c   : > { %p36_p3 = scmp.eq.s32.totalorder %s35_s23, 0  ;;  %s38_s22 = sadd.s32 1, %s1815_s13 }
  0x4d   : > { %p45_p4 = scmp.ne.s32.totalorder %s1815_s13, %s1811_s12  ;;  %p51_p9 = scmp.ne.s32.totalorder %s1811_s12, %s1807_s11 }
  0x4e   : > { %s2043_s5 = scalar_select %p36_p3, %s1815_s13, %s38_s22  }
  0x4f   : > { %p2531_p10 = scmp.eq.s32.totalorder %s1819_s14, 0  ;;  %p2532_p8 = scmp.eq.s32.totalorder %s1941_s15, 0 }
  0x50   : > { %2530 = sst [smem:[#allocation31_spill]] %s2043_s5  ;;  %p159_p2 = scmp.eq.s32.totalorder %s1941_s15, 1 }
  0x51   : > { %p47_p5 = por %p2531_p10, %p45_p4  ;;  %p2049_p0 = por %p2532_p8, %p51_p9 }
  0x52   : > { %p165_p6 = scmp.eq.s32.totalorder %s1081_s19, 1  ;;  %s185_s21 = sand.u32 1, %s1815_s13  }
  0x53   : > { %s2533_s26 = scalar_select %p2049_p0, 1, 0 }
  0x54   : > { %s1194_s9 = sshll.u32 %s1819_s14, 8  ;;  %p2056_p12 = por %p159_p2, %p45_p4 }
  0x55   : > { %p2060_p11 = por %p165_p6, %p51_p9  ;;  %s1084_s23 = sshll.u32 %s185_s21, 4 }
  0x56   : > { %s2534_s20 = scalar_select %p2056_p12, 1, 0 }
  0x57   : > { %s2535_s8 = scalar_select %p2060_p11, 1, 0 }
  0x58   : > { %s2536_s1 = sld [smem:[#allocation33_spill]]  ;;  %s189_s19 = scalar_lea.vmem [#allocation4], %s1084_s23 }
  0x59   : > { %s196_s2 = sshll.u32 %s189_s19, 4  ;;  %p2537_p13 = scmp.lt.s32.totalorder %s1819_s14, 2  ;;  %s2075_s2 = int_to_ptr.vmem [resolvable:$true] %s196_s2 }
  0x5a   : > { %s2077_s13 = scalar_lea.sflag [#allocation5], %s185_s21 }
  0x5b   : > { %p2071_p7 = pnand %p2537_p13, %p47_p5 }
  0x5d   : > { %p1579_p4 = pneg %p2071_p7 }
  0x5e   : > { %s2067_s17 = scalar_lea.hbm %s2536_s1, %s1194_s9  ;;  %s1582_s22 = scalar_lea.hbm %s2536_s1, 512 }
  0x5f   : > { %s1577_s25 = scalar_lea.hbm %s2067_s17, 256  ;;  %p1583_p5 = scmp.lt.u32.totalorder %s2067_s17, %s2536_s1 }
  0x60   : > { %p1578_p3 = scmp.ne.s32.totalorder %s2067_s17, %s1577_s25  ;;  %p1584_p8 = scmp.lt.u32.totalorder %s1582_s22, %s1577_s25 }
  0x61   : > { %p1586_p6 = scmp.lt.u32.totalorder %s1577_s25, %s2067_s17 }
  0x62   : > { %p1580_p9 = pnand %p1579_p4, %p1578_p3  ;;  %p1585_p2 = por %p1584_p8, %p1583_p5 }
  0x64   : > { %p1581_p10 = pneg %p1580_p9  ;;  %p1587_p13 = por %p1586_p6, %p1585_p2 }
  0x66   : > { %p1588_p11 = pnand %p1587_p13, %p1581_p10 }
  0x68   : > { %1591 = shalt.err (!%p1588_p11)
}
  0x69   : > { %s1592_s21 = scalar_lea.vmem %s2075_s2, 256  ;;  %s1825_s9 = smov [#allocation4]  }
  0x6a   : > { %p1593_p3 = scmp.ne.s32.totalorder %s2075_s2, %s1592_s21  ;;  %s1597_s23 = sshll.u32 %s1825_s9, 4  ;;  %s1598_s23 = int_to_ptr.vmem [resolvable:$false] %s1597_s23 }
  0x6b   : > { %s1599_s27 = scalar_lea.vmem %s1598_s23, 512  ;;  %p1600_p0 = scmp.lt.s32.totalorder %s2075_s2, %s1598_s23 }
  0x6c   : > { %p1595_p9 = pnand %p1593_p3, %p1579_p4  ;;  %p1601_p5 = scmp.lt.s32.totalorder %s1599_s27, %s1592_s21 }
  0x6e   : > { %p1596_p12 = pneg %p1595_p9  ;;  %p1602_p8 = por %p1601_p5, %p1600_p0 }
  0x70   : > { %p1603_p2 = pnand %p1602_p8, %p1596_p12 }
  0x72   : > { %1606 = shalt.err (!%p1603_p2)
}
  0x73   : > { %s1826_s25 = smov 128   ;;  %s1827_s22 = smov 8  }
  0x74   : > { %1362 = dma.hbm_to_vmem [thread:$0]  (!%p2071_p7), %s2067_s17, 256, %s2075_s2, %s2077_s13, %s1826_s25, %s1826_s25, %s1827_s22  }
  0x75   : > { %s89_s19 = sld [smem:[#allocation3 + %s1819_s14]]  ;;  %p101_p0 = scmp.ne.s32.totalorder %s1791_s7, %s1787_s0 }
  0x76   : > { %s90_s21 = sld [smem:[#allocation3 + %s1944_s16]]  ;;  %p107_p12 = scmp.ne.s32.totalorder %s1787_s0, %s1783_s6 }
  0x77   : > { %s230_s9 = sand.u32 1, %s1791_s7   ;;  %p2539_p11 = scmp.eq.s32.totalorder %s1819_s14, 0 }
  0x78   : > { %s1090_s5 = sshll.u32 %s230_s9, 8  ;;  %p2541_p7 = scmp.eq.s32.totalorder %s1941_s15, 0 }
  0x79   : > { %p2114_p4 = por %p101_p0, %p2539_p11  ;;  %s94_s17 = sadd.s32 1, %s1791_s7 }
  0x7a   : > { %p2120_p10 = por %p107_p12, %p2541_p7  ;;  %s232_s27 = scalar_lea.vmem [#allocation9], %s1090_s5 }
  0x7b   : > { %s1347_s6 = scalar_select %p2114_p4, [#allocation3], [#allocation14] }
  0x7c   : > { %s2542_s2 = scalar_select %p2120_p10, 1, 0 }
  0x7d   : > { %s91_s13 = ssub.s32 %s89_s19, %s90_s21  ;;  %s240_s25 = sshll.u32 %s232_s27, 4  ;;  %s2148_s25 = int_to_ptr.vmem [resolvable:$true] %s240_s25 }
  0x7e   : > { %p92_p6 = scmp.eq.s32.totalorder %s91_s13, 0  ;;  %p2544_p13 = scmp.lt.s32.totalorder %s1819_s14, 2 }
  0x7f   : > { %s1348_s22 = scalar_select %p2114_p4, %s1819_s14, 0 }
  0x80   : > { %s2131_s9 = scalar_select %p92_p6, %s1791_s7, %s94_s17  }
  0x81   : > { %s2592_s6 = smov (!%p2544_p13, %s1347_s6), [#allocation17]  ;;  %p2545_p3 = pmov %p2544_p13 }
  0x82   : > { %2543 = sst [smem:[#allocation32_spill]] %s2131_s9  ;;  %p129_p8 = scmp.ne.s32.totalorder %s1779_s30, %s1775_s29 }
  0x83   : > { %s2594_s22 = smov (!%p2545_p3, %s1348_s22), 0  ;;  %p2546_p9 = pmov %p2545_p3 }
  0x84   : > { %s233_s19 = sld [smem:[%s2592_s6 + %s2594_s22]]  ;;  %p2549_p0 = pmov %p2539_p11 }
  0x85   : > { %p2141_p5 = pnand %p2546_p9, %p2114_p4  ;;  %s2146_s21 = sld [smem:[#allocation3 + %s1819_s14]] }
  0x86   : > { %s2151_s5 = sld [smem:[#allocation3 + %s1944_s16]]  ;;  %p2165_p12 = por %p129_p8, %p2549_p0 }
  0x87   : > { %s2548_s3 = sld [smem:[#allocation35_spill]]  ;;  %p1609_p4 = pneg %p2141_p5 }
  0x8a   : > { %s1196_s13 = sshll.u32 %s233_s19, 12 }
  0x8d   : > { %s2161_s10 = scalar_lea.hbm %s2548_s3, %s1196_s13  ;;  %s1612_s27 = scalar_lea.hbm %s2548_s3, 53248 }
  0x8e   : > { %s1607_s22 = scalar_lea.hbm %s2161_s10, 4096  ;;  %p1613_p13 = scmp.lt.u32.totalorder %s2161_s10, %s2548_s3 }
  0x8f   : > { %p1608_p11 = scmp.ne.s32.totalorder %s2161_s10, %s1607_s22  ;;  %p1614_p3 = scmp.lt.u32.totalorder %s1612_s27, %s1607_s22 }
  0x90   : > { %p1616_p8 = scmp.lt.u32.totalorder %s1607_s22, %s2161_s10 }
  0x91   : > { %p1610_p7 = pnand %p1609_p4, %p1608_p11  ;;  %p1615_p9 = por %p1614_p3, %p1613_p13 }
  0x93   : > { %p1611_p6 = pneg %p1610_p7  ;;  %p1617_p0 = por %p1616_p8, %p1615_p9 }
  0x95   : > { %p1618_p2 = pnand %p1617_p0, %p1611_p6 }
  0x97   : > { %1621 = shalt.err (!%p1618_p2)
}
  0x98   : > { %s1622_s9 = scalar_lea.vmem %s2148_s25, 4096  ;;  %s1828_s19 = smov [#allocation9]  }
  0x99   : > { %p1623_p11 = scmp.ne.s32.totalorder %s2148_s25, %s1622_s9  ;;  %s1627_s13 = sshll.u32 %s1828_s19, 4  ;;  %s1628_s13 = int_to_ptr.vmem [resolvable:$false] %s1627_s13 }
  0x9a   : > { %s1629_s17 = scalar_lea.vmem %s1628_s13, 8192  ;;  %p1630_p1 = scmp.lt.s32.totalorder %s2148_s25, %s1628_s13 }
  0x9b   : > { %p1625_p7 = pnand %p1623_p11, %p1609_p4  ;;  %p1631_p13 = scmp.lt.s32.totalorder %s1629_s17, %s1622_s9 }
  0x9d   : > { %p1626_p10 = pneg %p1625_p7  ;;  %p1632_p3 = por %p1631_p13, %p1630_p1 }
  0x9f   : > { %p1633_p9 = pnand %p1632_p3, %p1626_p10 }
  0xa1   : > { %1636 = shalt.err (!%p1633_p9)
}
  0xa2   : > { %s2551_s22 = smov 4   ;;  %s2552_s27 = smov 64  }
  0xa3   : > { %1372 = dma.hbm_to_vmem [thread:$0]  (!%p2141_p5), %s2161_s10, 4096, %s2148_s25, %s2003_s24, %s2552_s27, %s2552_s27, %s2551_s22  }
  0xa4   : > { %p2553_p1 = scmp.eq.s32.totalorder %s1941_s15, 0  ;;  %p2554_p10 = scmp.ne.s32.totalorder %s1775_s29, %s1771_s28 }
  0xa5   : > { %s119_s9 = ssub.s32 %s2146_s21, %s2151_s5  ;;  %s122_s23 = sadd.s32 1, %s1779_s30 }
  0xa6   : > { %p2203_p2 = por %p2554_p10, %p2553_p1  ;;  %p120_p4 = scmp.eq.s32.totalorder %s119_s9, 0 }
  0xa7   : > { %s2556_s19 = sand.u32 1, %s1779_s30   ;;  %p2557_p6 = scmp.lt.s32.totalorder %s1819_s14, 2 }
  0xa8   : > { %s1093_s13 = sshll.u32 %s2556_s19, 3  ;;  %s2561_s9 = smov %s2556_s19 }
  0xa9   : > { %s1350_s17 = scalar_select %p2165_p12, [#allocation3], [#allocation15] }
  0xaa   : > { %s2215_s3 = scalar_select %p120_p4, %s1779_s30, %s122_s23  }
  0xab   : > { %s1351_s7 = scalar_select %p2165_p12, %s1819_s14, 0 }
  0xac   : > { %s2596_s17 = smov (!%p2557_p6, %s1350_s17), [#allocation18]  ;;  %p2558_p5 = pmov %p2557_p6 }
  0xad   : > { %s254_s24 = scalar_lea.vmem [#allocation10], %s1093_s13  ;;  %s251_s6 = scalar_lea.sflag [#allocation11], %s2561_s9 }
  0xae   : > { %s2598_s7 = smov (!%p2558_p5, %s1351_s7), 0  ;;  %p2559_p8 = pmov %p2558_p5 }
  0xaf   : > { %s255_s10 = sld [smem:[%s2596_s17 + %s2598_s7]]  ;;  %s262_s25 = sshll.u32 %s254_s24, 4  ;;  %s2232_s25 = int_to_ptr.vmem [resolvable:$true] %s262_s25 }
  0xb0   : > { %p2228_p0 = pnand %p2559_p8, %p2165_p12  ;;  %s1642_s13 = scalar_lea.hbm %s2497_s4, 1664 }
  0xb2   : > { %p1639_p11 = pneg %p2228_p0 }
  0xb5   : > { %s1094_s21 = sshll.u32 %s255_s10, 7 }
  0xb6   : > { %s2237_s27 = scalar_lea.hbm %s2497_s4, %s1094_s21 }
  0xb7   : > { %s1637_s23 = scalar_lea.hbm %s2237_s27, 128  ;;  %p1643_p3 = scmp.lt.u32.totalorder %s2237_s27, %s2497_s4 }
  0xb8   : > { %p1638_p12 = scmp.ne.s32.totalorder %s2237_s27, %s1637_s23  ;;  %p1644_p9 = scmp.lt.u32.totalorder %s1642_s13, %s1637_s23 }
  0xb9   : > { %p1646_p10 = scmp.lt.u32.totalorder %s1637_s23, %s2237_s27 }
  0xba   : > { %p1640_p7 = pnand %p1639_p11, %p1638_p12  ;;  %p1645_p1 = por %p1644_p9, %p1643_p3 }
  0xbc   : > { %p1641_p13 = pneg %p1640_p7  ;;  %p1647_p4 = por %p1646_p10, %p1645_p1 }
  0xbe   : > { %p1648_p6 = pnand %p1647_p4, %p1641_p13 }
  0xc0   : > { %1651 = shalt.err (!%p1648_p6)
}
  0xc1   : > { %s1652_s24 = scalar_lea.vmem %s2232_s25, 128  ;;  %s1829_s21 = smov [#allocation10]  }
  0xc2   : > { %p1653_p5 = scmp.ne.s32.totalorder %s2232_s25, %s1652_s24  ;;  %s1657_s5 = sshll.u32 %s1829_s21, 4  ;;  %s1658_s5 = int_to_ptr.vmem [resolvable:$false] %s1657_s5 }
  0xc3   : > { %s1659_s22 = scalar_lea.vmem %s1658_s5, 256  ;;  %p1660_p7 = scmp.lt.s32.totalorder %s2232_s25, %s1658_s5 }
  0xc4   : > { %p1655_p8 = pnand %p1653_p5, %p1639_p11  ;;  %p1661_p3 = scmp.lt.s32.totalorder %s1659_s22, %s1652_s24 }
  0xc6   : > { %p1656_p12 = pneg %p1655_p8  ;;  %p1662_p9 = por %p1661_p3, %p1660_p7 }
  0xc8   : > { %p1663_p1 = pnand %p1662_p9, %p1656_p12 }
  0xca   : > { %1666 = shalt.err (!%p1663_p1)
}
  0xcb   : > { %1377 = dma.hbm_to_vmem [thread:$0]  (!%p2228_p0), %s2237_s27, 128, %s2232_s25, %s251_s6  }
  0xcc   : > { %p2562_p13 = scmp.ne.s32.totalorder %s2528_s18, 0 }
  0xcd   : > { %s2269_s9 = sand.u32 (!%p2562_p13), 1, %s1811_s12   ;;  %p2563_p11 = scmp.ne.s32.totalorder (!%p2562_p13), %s2533_s26, 0 }
  0xce   : > { %271 = sbr.rel (%p2562_p13) target bundleno = 1377 (0x561), region = 36  ;;  %s1096_s23 = sshll.u32 (!%p2562_p13), %s2269_s9, 4 }
  0xcf   : > { %s274_s7 = scalar_lea.sflag (!%p2562_p13), [#allocation5], %s2269_s9  ;;  %s2275_s19 = scalar_lea.vmem (!%p2562_p13), [#allocation4], %s1096_s23 }
  0xd5   : > { %1750 = dma.done.wait (%p2563_p11), %s274_s7, 256  }
  0xd6   : > { %1752 = vsyncadd (%p2563_p11), %s274_s7, 4294967040  ;;  %s2564_s18 = sld [smem:[#allocation26_spill]]  ;;  %s2565_s28 = sld [smem:[#allocation29_spill]] }
  0xd7   : > { %s282_s25 = sand.u32 1, %s1941_s15  }
  0xd8   : > { %s283_s13 = scalar_lea.sflag [#allocation8], %s282_s25 }
  0xdc   : > { %s284_s27 = sand.u32 1, %s2564_s18   ;;  %p2566_p0 = scmp.ne.s32.totalorder %s2565_s28, 0 }
  0xdd   : > { %s1097_s6 = sshll.u32 %s284_s27, 6 }
  0xde   : > { %s2283_s17 = scalar_lea.vmem [#allocation7], %s1097_s6 }
  0xdf   : > { %1754 = dma.done.wait (%p2566_p0), %s283_s13, 1024  }
  0xe0   : > { %1756 = vsyncadd (%p2566_p0), %s283_s13, 4294966272  ;;  %s293_s10 = sand.u32 1, %s1787_s0   ;;  %p2567_p10 = scmp.ne.s32.totalorder %s2542_s2, 0 }
  0xe1   : > { %s1098_s24 = sshll.u32 %s293_s10, 8 }
  0xe2   : > { %s2290_s26 = scalar_lea.vmem [#allocation9], %s1098_s24 }
  0xe3   : > { %1758 = dma.done.wait (%p2567_p10), %s283_s13, 4096  }
  0xe4   : > { %1760 = vsyncadd (%p2567_p10), %s283_s13, 4294963200  ;;  %s300_s21 = sand.u32 1, %s1775_s29  }
  0xe5   : > { %s2297_s5 = sshll.u32 %s300_s21, 3  ;;  %s301_s22 = scalar_lea.sflag [#allocation11], %s300_s21 }
  0xe6   : > { %s304_s7 = scalar_lea.vmem [#allocation10], %s2297_s5 }
  0xe7   : > { %1762 = dma.done.wait (%p2203_p2), %s301_s22, 128  }
  0xe8   : > { %1764 = vsyncadd (%p2203_p2), %s301_s22, 4294967168  ;;  %v1830_v0 = vmov 0.0   ;;  %vm1831_vm0 = vmmov 0   ;;  %v1497_v1 = vld [vmem:[%s2283_s17] sm:$0xff]   ;;  %v1498_v2 = vld [vmem:[%s2283_s17 + $0x8] sm:$0xff]   ;;  %v382_v32 = vlaneseq  ;;  %s343_s2 = scalar_lea.vmem [#allocation12], %s1096_s23 }
  0xe9   : > { %1243 = vmatprep.subr.bf16.mxu0 %v1830_v0  ;;  %1259 = vmatprep.mubr.msk.bf16.mxu0 %vm1831_vm0, %v1830_v0  ;;  %v1499_v3 = vld [vmem:[%s2283_s17 + $0x10] sm:$0xff]   ;;  %v351_v5 = vld [vmem:[%s2275_s19 + $0x8] sm:$0xff]  ;;  %v1505_v6 = vld [vmem:[%s2290_s26] sm:$0xff]   ;;  %s942_s1 = sshll.u32 %s343_s2, 4  ;;  %s2568_s25 = sld [smem:[#allocation36_spill]]  ;;  %s2415_s1 = int_to_ptr.vmem [resolvable:$true] %s942_s1 }
  0xea   : > { %1263 = vmatprep.subr.bf16.mxu1 %v1830_v0  ;;  %1279 = vmatprep.mubr.msk.bf16.mxu1 %vm1831_vm0, %v1830_v0  ;;  %v350_v4 = vld [vmem:[%s2275_s19] sm:$0xff]  ;;  %vm353_vm2 = vcmp.ne.f32.partialorder %v351_v5, %v351_v5  ;;  %v1500_v7 = vld [vmem:[%s2283_s17 + $0x18] sm:$0xff]   ;;  %v1506_v10 = vld [vmem:[%s2290_s26 + $0x8] sm:$0xff]   ;;  %v2358_v33 = vshrl.u32 %v382_v32, 7  ;;  %s1197_s19 = sshll.u32 %s1941_s15, 8  ;;  %s929_s23 = scalar_lea.sflag [#allocation6], %s2269_s9 }
  0xeb   : > { %1244 = vmatpush3.bf16.msra.mxu0 %v1497_v1  ;;  %vm352_vm1 = vcmp.ne.f32.partialorder %v350_v4, %v350_v4  ;;  %v355_v9 = vsel %vm353_vm2, 0.0, %v351_v5  ;;  %1264 = vmatpush3.bf16.msra.mxu1 %v1505_v6  ;;  %v1501_v13 = vld [vmem:[%s2283_s17 + $0x20] sm:$0xff]   ;;  %v1507_v14 = vld [vmem:[%s2290_s26 + $0x10] sm:$0xff]   ;;  %v1502_v15 = vld [vmem:[%s2283_s17 + $0x28] sm:$0xff]   ;;  %s1667_s15 = scalar_lea.vmem %s2415_s1, 256  ;;  %p2569_p4 = scmp.ne.s32.totalorder %s2534_s20, 0 }
  0xec   : > { %1245 = vmatprep.subr.bf16.mxu0 %v1830_v0  ;;  %v354_v8 = vsel %vm352_vm1, 0.0, %v350_v4  ;;  %vm357_vm4 = vcmp.eq.f32.partialorder %v355_v9, inf  ;;  %1265 = vmatprep.subr.bf16.mxu1 %v1830_v0  ;;  %v1508_v18 = vld [vmem:[%s2290_s26 + $0x18] sm:$0xff]   ;;  %v1503_v19 = vld [vmem:[%s2283_s17 + $0x30] sm:$0xff]   ;;  %v1509_v20 = vld [vmem:[%s2290_s26 + $0x20] sm:$0xff]   ;;  %v384_v34 = vsub.s32 0, %v2358_v33  ;;  %p1668_p2 = scmp.ne.s32.totalorder %s2415_s1, %s1667_s15 }
  0xed   : > { %vm356_vm3 = vcmp.eq.f32.partialorder %v354_v8, inf  ;;  %v359_v12 = vsel %vm357_vm4, 3.4028235e+38, %v355_v9  ;;  %v1504_v21 = vld [vmem:[%s2283_s17 + $0x38] sm:$0xff]   ;;  %v1510_v22 = vld [vmem:[%s2290_s26 + $0x28] sm:$0xff]   ;;  %v1511_v24 = vld [vmem:[%s2290_s26 + $0x30] sm:$0xff]  }
  0xee   : > { %v358_v11 = vsel %vm356_vm3, 3.4028235e+38, %v354_v8  ;;  %vm361_vm6 = vcmp.eq.f32.partialorder %v359_v12, -inf  ;;  %v1512_v25 = vld [vmem:[%s2290_s26 + $0x38] sm:$0xff]   ;;  %v1513_v26 = vld [vmem:[%s2290_s26 + $0x40] sm:$0xff]   ;;  %v1514_v27 = vld [vmem:[%s2290_s26 + $0x48] sm:$0xff]   ;;  %p1669_p6 = pnand %p1668_p2, %p2569_p4 }
  0xef   : > { %1246 = vmatpush3.bf16.msra.mxu0 %v1498_v2  ;;  %vm360_vm5 = vcmp.eq.f32.partialorder %v358_v11, -inf  ;;  %1266 = vmatpush3.bf16.msra.mxu1 %v1506_v10  ;;  %v363_v17 = vsel %vm361_vm6, -3.4028235e+38, %v359_v12  ;;  %v1515_v28 = vld [vmem:[%s2290_s26 + $0x50] sm:$0xff]   ;;  %v1516_v29 = vld [vmem:[%s2290_s26 + $0x58] sm:$0xff]   ;;  %v1517_v30 = vld [vmem:[%s2290_s26 + $0x60] sm:$0xff]   ;;  %s2420_s27 = scalar_lea.hbm %s2568_s25, %s1197_s19 }
  0xf0   : > { %1247 = vmatprep.subr.bf16.mxu0 %v1830_v0  ;;  %v362_v16 = vsel %vm360_vm5, -3.4028235e+38, %v358_v11  ;;  %1267 = vmatprep.subr.bf16.mxu1 %v1830_v0  ;;  %v1518_v31 = vld [vmem:[%s2290_s26 + $0x68] sm:$0xff]   ;;  %v1519_v46 = vld [vmem:[%s2290_s26 + $0x70] sm:$0xff]   ;;  %v1520_v47 = vld [vmem:[%s2290_s26 + $0x78] sm:$0xff]   ;;  %v496_v54 = vsub.s32 1, %v2358_v33  ;;  %p1670_p5 = pneg %p1669_p6 }
  0xf1   : > { %v364_v23 = vpack.c.bf16 %v363_v17, %v362_v16  ;;  %v2363_v35 = vld [vmem:[%s304_s7] sm:$0xff]  ;;  %v1523_v50 = vld [vmem:[%s2290_s26 + $0x90] sm:$0xff]   ;;  %v1524_v51 = vld [vmem:[%s2290_s26 + $0x98] sm:$0xff]   ;;  %v609_v10 = vsub.s32 2, %v2358_v33  ;;  %s1832_s6 = smov [#allocation12]  }
  0xf2   : > { %v385_v36 = vrot.slane %v2363_v35, %v384_v34  ;;  %v1521_v48 = vld [vmem:[%s2290_s26 + $0x80] sm:$0xff]   ;;  %v1522_v49 = vld [vmem:[%s2290_s26 + $0x88] sm:$0xff]   ;;  %v497_v55 = vrot.slane %v2363_v35, %v496_v54  ;;  %v1527_v2 = vld [vmem:[%s2290_s26 + $0xb0] sm:$0xff]   ;;  %s1671_s13 = sshll.u32 %s1832_s6, 4  ;;  %s1672_s13 = int_to_ptr.vmem [resolvable:$false] %s1671_s13 }
  0xf3   : > { %1248 = vmatpush3.bf16.msra.mxu0 %v1499_v3  ;;  %1268 = vmatpush3.bf16.msra.mxu1 %v1507_v14  ;;  %v1525_v52 = vld [vmem:[%s2290_s26 + $0xa0] sm:$0xff]   ;;  %v1526_v53 = vld [vmem:[%s2290_s26 + $0xa8] sm:$0xff]   ;;  %v1528_v3 = vld [vmem:[%s2290_s26 + $0xb8] sm:$0xff]   ;;  %v610_v11 = vrot.slane %v2363_v35, %v609_v10  ;;  %s1673_s17 = scalar_lea.vmem %s1672_s13, 512  ;;  %p1674_p8 = scmp.lt.s32.totalorder %s2415_s1, %s1672_s13 }
  0xf4   : > { %1249 = vmatprep.subr.bf16.mxu0 %v1830_v0  ;;  %1269 = vmatprep.subr.bf16.mxu1 %v1830_v0  ;;  %v1529_v4 = vld [vmem:[%s2290_s26 + $0xc0] sm:$0xff]   ;;  %v1530_v5 = vld [vmem:[%s2290_s26 + $0xc8] sm:$0xff]   ;;  %v1531_v6 = vld [vmem:[%s2290_s26 + $0xd0] sm:$0xff]   ;;  %p1675_p12 = scmp.lt.s32.totalorder %s1673_s17, %s1667_s15 }
  0xf5   : > { %v1533_v8 = vld [vmem:[%s2290_s26 + $0xe0] sm:$0xff]   ;;  %v1534_v9 = vld [vmem:[%s2290_s26 + $0xe8] sm:$0xff]  }
  0xf6   : > { %p1676_p7 = por %p1675_p12, %p1674_p8 }
  0xf7   : > { %1250 = vmatpush3.bf16.msra.mxu0 %v1500_v7  ;;  %1270 = vmatpush3.bf16.msra.mxu1 %v1508_v18  ;;  %v1532_v7 = vld [vmem:[%s2290_s26 + $0xd8] sm:$0xff]  }
  0xf8   : > { %1251 = vmatprep.subr.bf16.mxu0 %v1830_v0  ;;  %1271 = vmatprep.subr.bf16.mxu1 %v1830_v0  ;;  %p1677_p3 = pnand %p1676_p7, %p1670_p5 }
  0xfb   : > { %1252 = vmatpush3.bf16.msra.mxu0 %v1501_v13  ;;  %1272 = vmatpush3.bf16.msra.mxu1 %v1509_v20 }
  0xfc   : > { %1253 = vmatprep.subr.bf16.mxu0 %v1830_v0  ;;  %1273 = vmatprep.subr.bf16.mxu1 %v1830_v0 }
  0xff   : > { %1254 = vmatpush3.bf16.msra.mxu0 %v1502_v15  ;;  %1274 = vmatpush3.bf16.msra.mxu1 %v1510_v22  ;;  %v1536_v22 = vld [vmem:[%s2290_s26 + $0xf8] sm:$0xff]  }
 0x100   : > { %1255 = vmatprep.subr.bf16.mxu0 %v1830_v0  ;;  %1275 = vmatprep.subr.bf16.mxu1 %v1830_v0 }
 0x103   : > { %1256 = vmatpush3.bf16.msra.mxu0 %v1503_v19  ;;  %1276 = vmatpush3.bf16.msra.mxu1 %v1511_v24 }
 0x104   : > { %1257 = vmatprep.subr.bf16.mxu0 %v1830_v0  ;;  %1277 = vmatprep.subr.bf16.mxu1 %v1830_v0 }
 0x107   : > { %1258 = vmatpush3.bf16.msra.mxu0 %v1504_v21  ;;  %1278 = vmatpush3.bf16.msra.mxu1 %v1512_v25  ;;  %v1535_v21 = vld [vmem:[%s2290_s26 + $0xf0] sm:$0xff]  }
 0x108   : > { %1283 = vmatprep.subr.bf16.mxu0 %v1830_v0  ;;  %1303 = vmatprep.subr.bf16.mxu1 %v1830_v0 }
 0x10a   : > { %1260 = vmatmul.mubr.bf16.vlgmr.msra.gmra.mrb[0].mxu0 %v364_v23  ;;  %v722_v23 = vsub.s32 3, %v2358_v33 }
 0x10b   : > { %1299 = vmatprep.mubr.msk.bf16.mxu0 %vm1831_vm0, %v1830_v0  ;;  %1284 = vmatpush3.bf16.msra.mxu0 %v1513_v26 }
 0x10c   : > { %1285 = vmatprep.subr.bf16.mxu0 %v1830_v0  ;;  %v723_v24 = vrot.slane %v2363_v35, %v722_v23 }
 0x10f   : > { %1286 = vmatpush3.bf16.msra.mxu0 %v1514_v27 }
 0x110   : > { %1287 = vmatprep.subr.bf16.mxu0 %v1830_v0 }
 0x113   : > { %1288 = vmatpush3.bf16.msra.mxu0 %v1515_v28 }
 0x114   : > { %1289 = vmatprep.subr.bf16.mxu0 %v1830_v0 }
 0x117   : > { %1290 = vmatpush3.bf16.msra.mxu0 %v1516_v29 }
 0x118   : > { %1291 = vmatprep.subr.bf16.mxu0 %v1830_v0 }
 0x11b   : > { %1292 = vmatpush3.bf16.msra.mxu0 %v1517_v30 }
 0x11c   : > { %1293 = vmatprep.subr.bf16.mxu0 %v1830_v0 }
 0x11f   : > { %1294 = vmatpush3.bf16.msra.mxu0 %v1518_v31 }
 0x120   : > { %1295 = vmatprep.subr.bf16.mxu0 %v1830_v0 }
 0x123   : > { %1296 = vmatpush3.bf16.msra.mxu0 %v1519_v46 }
 0x124   : > { %1297 = vmatprep.subr.bf16.mxu0 %v1830_v0 }
 0x127   : > { %1298 = vmatpush3.bf16.msra.mxu0 %v1520_v47 }
 0x128   : > { %1323 = vmatprep.subr.bf16.mxu0 %v1830_v0 }
 0x1dd   : > { %v468_v37 = vpop.f32.mrb[0].mxu0 }
 0x1de   : > { %v469_v38 = vadd.f32 %v468_v37, %v385_v36  ;;  %v1261_v39 = vpop.f32.mrb[1].mxu0 }
 0x1df   : > { %v471_v40 = vpop.f32.mrb[2].mxu0 }
 0x1e0   : > { %v472_v41 = vadd.f32 %v471_v40, %v385_v36  ;;  %v1262_v42 = vpop.f32.mrb[3].mxu0  ;;  %v475_v43 = vmax.f32 %v469_v38, 0.0 }
 0x1e2   : > { %v476_v44 = vmax.f32 %v472_v41, 0.0 }
 0x1e4   : > { %v477_v45 = vpack.c.bf16 %v476_v44, %v475_v43 }
 0x1e6   : > { %1280 = vmatmul.mubr.bf16.vlgmr.msra.gmra.mrb[0].mxu1 %v477_v45 }
 0x1e7   : > { %1319 = vmatprep.mubr.msk.bf16.mxu1 %vm1831_vm0, %v1830_v0  ;;  %1304 = vmatpush3.bf16.msra.mxu1 %v1521_v48 }
 0x1e8   : > { %1305 = vmatprep.subr.bf16.mxu1 %v1830_v0 }
 0x1eb   : > { %1306 = vmatpush3.bf16.msra.mxu1 %v1522_v49 }
 0x1ec   : > { %1307 = vmatprep.subr.bf16.mxu1 %v1830_v0 }
 0x1ef   : > { %1308 = vmatpush3.bf16.msra.mxu1 %v1523_v50 }
 0x1f0   : > { %1309 = vmatprep.subr.bf16.mxu1 %v1830_v0 }
 0x1f3   : > { %1310 = vmatpush3.bf16.msra.mxu1 %v1524_v51 }
 0x1f4   : > { %1311 = vmatprep.subr.bf16.mxu1 %v1830_v0 }
 0x1f7   : > { %1312 = vmatpush3.bf16.msra.mxu1 %v1525_v52 }
 0x1f8   : > { %1313 = vmatprep.subr.bf16.mxu1 %v1830_v0 }
 0x1fb   : > { %1314 = vmatpush3.bf16.msra.mxu1 %v1526_v53 }
 0x1fc   : > { %1315 = vmatprep.subr.bf16.mxu1 %v1830_v0 }
 0x1ff   : > { %1316 = vmatpush3.bf16.msra.mxu1 %v1527_v2 }
 0x200   : > { %1317 = vmatprep.subr.bf16.mxu1 %v1830_v0 }
 0x203   : > { %1318 = vmatpush3.bf16.msra.mxu1 %v1528_v3 }
 0x2b9   : > { %v580_v56 = vpop.f32.mrb[0].mxu1 }
 0x2ba   : > { %v581_v57 = vadd.f32 %v580_v56, %v497_v55  ;;  %v1281_v58 = vpop.f32.mrb[1].mxu1 }
 0x2bb   : > { %v583_v59 = vpop.f32.mrb[2].mxu1 }
 0x2bc   : > { %v584_v60 = vadd.f32 %v583_v59, %v497_v55  ;;  %v1282_v61 = vpop.f32.mrb[3].mxu1  ;;  %v587_v62 = vmax.f32 %v581_v57, 0.0 }
 0x2be   : > { %v588_v63 = vmax.f32 %v584_v60, 0.0 }
 0x2c0   : > { %v589_v1 = vpack.c.bf16 %v588_v63, %v587_v62 }
 0x2c2   : > { %1300 = vmatmul.mubr.bf16.vlgmr.msra.gmra.mrb[4].mxu0 %v589_v1 }
 0x2c3   : > { %1339 = vmatprep.mubr.msk.bf16.mxu0 %vm1831_vm0, %v1830_v0  ;;  %1324 = vmatpush3.bf16.msra.mxu0 %v1529_v4 }
 0x2c4   : > { %1325 = vmatprep.subr.bf16.mxu0 %v1830_v0 }
 0x2c7   : > { %1326 = vmatpush3.bf16.msra.mxu0 %v1530_v5 }
 0x2c8   : > { %1327 = vmatprep.subr.bf16.mxu0 %v1830_v0 }
 0x2cb   : > { %1328 = vmatpush3.bf16.msra.mxu0 %v1531_v6 }
 0x2cc   : > { %1329 = vmatprep.subr.bf16.mxu0 %v1830_v0 }
 0x2cf   : > { %1330 = vmatpush3.bf16.msra.mxu0 %v1532_v7 }
 0x2d0   : > { %1331 = vmatprep.subr.bf16.mxu0 %v1830_v0 }
 0x2d3   : > { %1332 = vmatpush3.bf16.msra.mxu0 %v1533_v8 }
 0x2d4   : > { %1333 = vmatprep.subr.bf16.mxu0 %v1830_v0 }
 0x2d7   : > { %1334 = vmatpush3.bf16.msra.mxu0 %v1534_v9 }
 0x2d8   : > { %1335 = vmatprep.subr.bf16.mxu0 %v1830_v0 }
 0x2db   : > { %1336 = vmatpush3.bf16.msra.mxu0 %v1535_v21 }
 0x2dc   : > { %1337 = vmatprep.subr.bf16.mxu0 %v1830_v0  ;;  %v835_v0 = vsub.s32 4, %v2358_v33 }
 0x2de   : > { %v836_v36 = vrot.slane %v2363_v35, %v835_v0 }
 0x2df   : > { %1338 = vmatpush3.bf16.msra.mxu0 %v1536_v22 }
 0x395   : > { %v693_v12 = vpop.f32.mrb[4].mxu0 }
 0x396   : > { %v694_v13 = vadd.f32 %v693_v12, %v610_v11  ;;  %v1301_v14 = vpop.f32.mrb[5].mxu0 }
 0x397   : > { %v696_v15 = vpop.f32.mrb[6].mxu0 }
 0x398   : > { %v697_v16 = vadd.f32 %v696_v15, %v610_v11  ;;  %v1302_v17 = vpop.f32.mrb[7].mxu0  ;;  %v700_v18 = vmax.f32 %v694_v13, 0.0 }
 0x39a   : > { %v701_v19 = vmax.f32 %v697_v16, 0.0 }
 0x39c   : > { %v702_v20 = vpack.c.bf16 %v701_v19, %v700_v18 }
 0x39e   : > { %1320 = vmatmul.mubr.bf16.vlgmr.msra.gmra.mrb[4].mxu1 %v702_v20 }
 0x471   : > { %v806_v25 = vpop.f32.mrb[4].mxu1 }
 0x472   : > { %v807_v26 = vadd.f32 %v806_v25, %v723_v24  ;;  %v1321_v27 = vpop.f32.mrb[5].mxu1 }
 0x473   : > { %v809_v28 = vpop.f32.mrb[6].mxu1 }
 0x474   : > { %v810_v29 = vadd.f32 %v809_v28, %v723_v24  ;;  %v1322_v30 = vpop.f32.mrb[7].mxu1  ;;  %v813_v31 = vmax.f32 %v807_v26, 0.0 }
 0x476   : > { %v814_v32 = vmax.f32 %v810_v29, 0.0 }
 0x478   : > { %v815_v34 = vpack.c.bf16 %v814_v32, %v813_v31 }
 0x47a   : > { %1340 = vmatmul.mubr.bf16.vlgmr.msra.gmra.mrb[8].mxu0 %v815_v34 }
 0x54d   : > { %v919_v37 = vpop.f32.mrb[8].mxu0 }
 0x54e   : > { %v920_v38 = vadd.f32 %v919_v37, %v836_v36  ;;  %v1341_v39 = vpop.f32.mrb[9].mxu0 }
 0x54f   : > { %v922_v40 = vpop.f32.mrb[10].mxu0 }
 0x550   : > { %926 = vst [vmem:[%s343_s2] sm:$0xff] %v920_v38  ;;  %v923_v33 = vadd.f32 %v922_v40, %v836_v36  ;;  %v1342_v35 = vpop.f32.mrb[11].mxu0 }
 0x552   : > { %927 = vst [vmem:[%s343_s2 + $0x8] sm:$0xff] %v923_v33 }
 0x553   : > { %1680 = shalt.err (!%p1677_p3)
}
 0x554   : > { %s1681_s10 = scalar_lea.hbm %s2420_s27, 256  ;;  %s1685_s21 = scalar_lea.hbm %s2568_s25, 512 }
 0x555   : > { %p1682_p9 = scmp.ne.s32.totalorder %s2420_s27, %s1681_s10  ;;  %p1686_p11 = scmp.lt.u32.totalorder %s2420_s27, %s2568_s25 }
 0x556   : > { %p1687_p0 = scmp.lt.u32.totalorder %s1685_s21, %s1681_s10  ;;  %p1689_p2 = scmp.lt.u32.totalorder %s1681_s10, %s2420_s27 }
 0x557   : > { %p1683_p1 = pnand %p1682_p9, %p2569_p4 }
 0x558   : > { %p1688_p10 = por %p1687_p0, %p1686_p11 }
 0x559   : > { %p1684_p13 = pneg %p1683_p1 }
 0x55a   : > { %p1690_p6 = por %p1689_p2, %p1688_p10 }
 0x55c   : > { %p1691_p5 = pnand %p1690_p6, %p1684_p13 }
 0x55e   : > { %1694 = shalt.err (!%p1691_p5)
}
 0x55f   : > { %s1833_s7 = smov 128   ;;  %s1834_s2 = smov 8  }
 0x560   : > { %1357 = dma.vmem_to_hbm [thread:$0]  (%p2569_p4), %s2415_s1, 256, %s2420_s27, %s929_s23, %s1833_s7, %s1833_s7, %s1834_s2  }
 0x561 PF: > { %s957_s19 = sand.u32 1, %s1807_s11   ;;  %p2570_p8 = scmp.ne.s32.totalorder %s2535_s8, 0 }
 0x562   : > { %p2571_p12 = scmp.ge.s32.totalorder %s1819_s14, 2  ;;  %s958_s18 = scalar_lea.sflag [#allocation6], %s957_s19 }
 0x564   : > { %p1379_p7 = pnand %p2571_p12, %p2570_p8 }
 0x566   : > { %1766 = dma.done.wait (!%p1379_p7), %s958_s18, 256  }
 0x567   : > { %1768 = vsyncadd (!%p1379_p7), %s958_s18, 4294967040  ;;  %s2572_s15 = sld [smem:[#allocation25_spill]]  ;;  %s2573_s7 = sld [smem:[#allocation32_spill]] }
 0x568   : > { %s2574_s8 = sld [smem:[#allocation26_spill]]  ;;  %s2575_s9 = sld [smem:[#allocation27_spill]] }
 0x569   : > { %s2576_s10 = sld [smem:[#allocation30_spill]]  ;;  %s2577_s20 = sld [smem:[#allocation28_spill]] }
 0x56a   : > { %s2578_s13 = sld [smem:[#allocation31_spill]]  ;;  %p28_p4 = scmp.ge.s32.totalorder %s1944_s16, 4  }
 0x56b   : > { %s2579_s28 = smov %s1775_s29  ;;  %s2580_s29 = smov %s1779_s30 }
 0x56c   : > { %s2581_s30 = smov %s2215_s3  ;;  %s2582_s6 = smov %s1787_s0 }
 0x56d   : > { %s2583_s0 = smov %s2572_s15  ;;  %s2584_s11 = smov %s1811_s12 }
 0x56e   : > { %s2586_s14 = smov %s1944_s16  ;;  %30 = sbr.rel (!%p28_p4) target bundleno = 27 (0x1b), region = 121 }
 0x56f   : > { %s2585_s12 = smov %s2577_s20 }
 0x575   :  { %963 = vsyncpa [#allocation5], 1 }
 0x576   :  { %965 = vsyncpa [#allocation5 + $0x1], 1 }
 0x577   :  { %966 = vsyncpa [#allocation8], 1 }
 0x578   :  { %968 = vsyncpa [#allocation8 + $0x1], 1 }
 0x579   :  { %969 = vsyncpa [#allocation11], 1 }
 0x57a   :  { %971 = vsyncpa [#allocation11 + $0x1], 1 }
 0x57b   :  { %972 = vsyncpa [#allocation6], 1 }
 0x57c   :  { %974 = vsyncpa [#allocation6 + $0x1], 1 }

</bundles_post_ra>
